<compile_context>
chip_gen: v5e
topology: v5e:2x2
jax: 0.10.0
libtpu: 0.0.40
codegen_flags: <defaults>
</compile_context>

<pallas_src>
import math

import jax
import jax.numpy as jnp
from jax.experimental import pallas as pl
from jax.experimental.pallas import tpu as pltpu


def _make_kernel(kernel_sizes, L, W):
    """Kernel over one batch-group block: lane axis W = nb * L, lane j maps to
    batch element j // L at within-element position j % L."""
    n_layers = len(kernel_sizes)

    def kernel(x_ref, *rest):
        w_refs = rest[:n_layers]          # per-layer (K, OC, IC) weight tiles
        o_ref = rest[n_layers]

        # Hoisted boundary masks: one compare per distinct nonzero tap shift,
        # shared across layers (layer-2's +/-1 taps reuse layer-1's masks).
        pos = jax.lax.broadcasted_iota(jnp.int32, (1, W), 1) % L
        shifts = sorted({k - ks // 2 for ks in kernel_sizes for k in range(ks)} - {0})
        masks = {s: (pos >= -s) if s < 0 else (pos < L - s) for s in shifts}

        h = x_ref[...].astype(jnp.float32)                 # (IC, W)
        for li in range(n_layers):
            K = kernel_sizes[li]
            p = K // 2
            w_l = w_refs[li]
            # centre tap first: no roll, no mask, seeds the accumulator
            acc = jnp.dot(w_l[p], h, preferred_element_type=jnp.float32)
            for k in range(K):                             # static tiny tap loop
                if k == p:
                    continue
                s = k - p
                # r[:, j] = h[:, j + s] (lane rotation on the XLU slot), zeroed
                # where j + s crosses a batch-element boundary.
                r = pltpu.roll(h, shift=(-s) % W, axis=1)
                r = jnp.where(masks[s], r, 0.0)
                acc = acc + jnp.dot(w_l[k], r, preferred_element_type=jnp.float32)
            h = jnp.maximum(acc, 0.0)                      # fused conv + ReLU
            # TODO(synk): A/B this per-tap MXU dot against (a) one deep
            # (OC,K*IC)x(K*IC,W) dot fed from a VMEM scratch slab and (b) a
            # pure-VPU multiply-add path on v5e (MXU is <2% utilized here).

        o_ref[...] = h.astype(o_ref.dtype)

    return kernel


def _pick_batch_group(N, L, in_chs, out_chs):
    """Pick nb (batch elems per block) so that W = nb*L is a multiple of 128
    (dense, unmasked vst), the block is a few MiB (amortizes the ~0.35us/step
    grid overhead), the footprint fits a per-generation-safe VMEM budget, and
    -- when the problem is big enough -- the grid has >= 2 steps so v7x can
    split the parallel axis across its two TensorCores."""
    base = 128 // math.gcd(L, 128)           # smallest nb keeping W % 128 == 0
    ic0, oc_last = in_chs[0], out_chs[-1]
    max_ic, max_oc = max(in_chs), max(out_chs)
    # rough per-lane f32 bytes: pipelined in/out blocks + live intermediates + masks
    per_lane = 4 * (3 * ic0 + 3 * oc_last + 3 * max_ic + 2 * max_oc + 4)
    budget = 24 << 20                        # per-block budget, safe on v7x (64 MiB VMEM)
    target_lanes = min(32768, max(128, budget // per_lane))
    nb = max(base, (target_lanes // L) // base * base)
    n_pad0 = pl.cdiv(N, base) * base         # minimal batch padding
    nb = min(nb, n_pad0)
    # keep grid >= 2 when the padded batch allows it (v7x dual-TC utilization)
    if n_pad0 >= 2 * base and nb > n_pad0 // 2:
        nb = max(base, (n_pad0 // 2) // base * base)
    n_pad = pl.cdiv(n_pad0, nb) * nb
    # TODO(synk): for very large L (base*L lanes blow the budget) tile along L
    # with a halo instead of folding whole batch elements into lanes.
    return nb, n_pad


def cross_partial_residual(x, weights, base_channels, in_chs, out_chs, kernel_sizes):
    """x: (N, C, L) f32; weights[i]: (out_chs[i], in_chs[i], kernel_sizes[i]) f32."""
    N, C, L = x.shape
    n_layers = len(kernel_sizes)
    assert C - base_channels == in_chs[0], "conv stack input channels mismatch"
    for i in range(1, n_layers):
        assert in_chs[i] == out_chs[i - 1], "conv stack channels must chain"
    # TODO(synk): even kernel sizes change the sequence length in PyTorch
    # (padding=ks//2 gives L+1); only odd kernel sizes ("same" conv) supported.
    assert all(k % 2 == 1 for k in kernel_sizes)

    oc_last = out_chs[-1]

    # ---- layout glue (plain XLA): base channels bypass the kernel ----------
    xc = x[:, base_channels:, :]                            # (N, IC0, L)

    nb, n_pad = _pick_batch_group(N, L, in_chs, out_chs)
    if n_pad != N:
        xc = jnp.pad(xc, ((0, n_pad - N), (0, 0), (0, 0)))  # zero elems stay zero

    M = n_pad * L
    W = nb * L
    n_blocks = M // W

    # (N_pad, IC0, L) -> (IC0, N_pad*L): each batch element owns L contiguous lanes.
    # TODO(synk): when L % 128 == 0 this transpose round-trip can be skipped by
    # feeding (nb, IC0, L) blocks directly; for general L the lane-dense packing
    # needs this relayout (kept under one jit so slice+pad+transpose can fuse).
    x_m = jnp.transpose(xc, (1, 0, 2)).reshape(in_chs[0], M).astype(jnp.float32)

    # per-layer weights as (K, OC, IC): kernel indexes tap k via a cheap
    # leading-axis index instead of lane-slicing a fused (OC, K*IC) matrix.
    w_taps = [jnp.transpose(w, (2, 0, 1)).astype(jnp.float32) for w in weights]

    kernel = _make_kernel(tuple(kernel_sizes), L, W)

    # triple-buffer the streamed operands once the grid is long enough to care;
    # weights keep the default (constant block index -> fetched once).
    stream_kw = {"pipeline_mode": pl.Buffered(3)} if n_blocks >= 3 else {}
    in_specs = [pl.BlockSpec((in_chs[0], W), lambda g: (0, g), **stream_kw)]
    for wt in w_taps:
        in_specs.append(pl.BlockSpec(wt.shape, lambda g: (0, 0, 0)))
    out_specs = pl.BlockSpec((oc_last, W), lambda g: (0, g), **stream_kw)

    y_m = pl.pallas_call(
        kernel,
        out_shape=jax.ShapeDtypeStruct((oc_last, M), jnp.float32),
        grid_spec=pltpu.PrefetchScalarGridSpec(
            num_scalar_prefetch=0,
            grid=(n_blocks,),
            in_specs=in_specs,
            out_specs=out_specs),
        compiler_params=pltpu.CompilerParams(
            dimension_semantics=("parallel",),
            vmem_limit_bytes=48 * 1024 * 1024),
    )(x_m, *w_taps)

    # undo layout: (OC, N_pad*L) -> (N, OC, L), then concat base channels (XLA)
    y = jnp.transpose(y_m.reshape(oc_last, n_pad, L), (1, 0, 2))[:N]
    return jnp.concatenate([x[:, :base_channels, :], y.astype(x.dtype)], axis=1)


def reference(x, weights, base_channels):
    """Pure-JAX reference mirroring the PyTorch forward."""
    base = x[:, :base_channels, :]
    h = x[:, base_channels:, :]
    for w in weights:
        ks = w.shape[-1]
        h = jax.lax.conv_general_dilated(
            h, w, window_strides=(1,), padding=[(ks // 2, ks // 2)],
            dimension_numbers=('NCH', 'OIH', 'NCH'))
        h = jnp.maximum(h, 0.0)
    return jnp.concatenate([base, h], axis=1)


if __name__ == "__main__":
    # Module configuration (matches __init__ signature)
    in_channels = [4, 8]
    out_channels = [8, 4]
    kernel_sizes = [3, 5]
    base_channels = in_channels[0]

    N, L = 2, 16
    C = base_channels + in_channels[0]   # pass-through + conv-stack channels

    key = jax.random.PRNGKey(0)
    kx, *kws = jax.random.split(key, 1 + len(in_channels))
    x = jax.random.normal(kx, (N, C, L), dtype=jnp.float32)

    # Deterministic synthetic weights: (out_chan, in_chan, ks), bias=False
    weights = []
    for k, ic, oc, ks in zip(kws, in_channels, out_channels, kernel_sizes):
        fan_in = ic * ks
        weights.append(jax.random.normal(k, (oc, ic, ks), jnp.float32) / jnp.sqrt(fan_in))

    fwd = jax.jit(lambda xx, ws: cross_partial_residual(
        xx, ws, base_channels, in_channels, out_channels, kernel_sizes))
    out = jax.block_until_ready(fwd(x, weights))

    ref = reference(x, weights, base_channels)
    assert out.shape == (N, base_channels + out_channels[-1], L), out.shape
    max_err = float(jnp.max(jnp.abs(out - ref)))
    assert jnp.allclose(out, ref, atol=1e-5, rtol=1e-5), f"max abs err {max_err}"
    print("KERNEL_OK")
</pallas_src>

<mosaic_0001>
module attributes {stable_mosaic.version = 11 : i64} {
  func.func @kernel(%arg0: i32, %arg1: memref<4x128xf32, #tpu.memory_space<vmem>>, %arg2: memref<3x8x4xf32, #tpu.memory_space<vmem>>, %arg3: memref<5x4x8xf32, #tpu.memory_space<vmem>>, %arg4: memref<4x128xf32, #tpu.memory_space<vmem>>) attributes {dimension_semantics = [#tpu.dimension_semantics<parallel>], iteration_bounds = array<i64: 1>, scalar_prefetch = 0 : i64, scratch_operands = 0 : i64, tpu.core_type = #tpu.core_type<tc>, window_params = [{transform_indices = @transform_0, window_bounds = array<i64: 4, 128>}, {pipeline_mode = #tpu.pipeline_mode<synchronous>, transform_indices = @transform_1, window_bounds = array<i64: 3, 8, 4>}, {pipeline_mode = #tpu.pipeline_mode<synchronous>, transform_indices = @transform_2, window_bounds = array<i64: 5, 4, 8>}, {transform_indices = @transform_3, window_bounds = array<i64: 4, 128>}]} {
    %0 = tpu.iota {dimensions = array<i32: 1>} : vector<1x128xi32>
    %c16_i32 = arith.constant 16 : i32
    %c0_i32 = arith.constant 0 : i32
    %1 = arith.cmpi eq, %c16_i32, %c0_i32 : i32
    %c1_i32 = arith.constant 1 : i32
    %2 = arith.select %1, %c1_i32, %c16_i32 : i32
    %3 = vector.broadcast %2 : i32 to vector<1x128xi32>
    %4 = arith.remsi %0, %3 : vector<1x128xi32>
    %c0_i32_0 = arith.constant 0 : i32
    %5 = vector.broadcast %c0_i32_0 : i32 to vector<1x128xi32>
    %6 = arith.cmpi ne, %4, %5 : vector<1x128xi32>
    %c0_i32_1 = arith.constant 0 : i32
    %7 = vector.broadcast %c0_i32_1 : i32 to vector<1x128xi32>
    %8 = arith.cmpi slt, %4, %7 : vector<1x128xi32>
    %c0_i32_2 = arith.constant 0 : i32
    %9 = arith.cmpi slt, %2, %c0_i32_2 : i32
    %10 = vector.broadcast %9 : i1 to vector<1x128xi1>
    %11 = vector.broadcast %10 : vector<1x128xi1> to vector<1x128xi1>
    %12 = arith.xori %8, %11 : vector<1x128xi1>
    %13 = arith.andi %12, %6 : vector<1x128xi1>
    %14 = vector.broadcast %2 : i32 to vector<1x128xi32>
    %15 = arith.addi %4, %14 : vector<1x128xi32>
    %16 = arith.select %13, %15, %4 : vector<1x128xi1>, vector<1x128xi32>
    %c2_i32 = arith.constant 2 : i32
    %17 = vector.broadcast %c2_i32 : i32 to vector<1x128xi32>
    %18 = arith.cmpi sge, %16, %17 : vector<1x128xi32>
    %c1_i32_3 = arith.constant 1 : i32
    %19 = vector.broadcast %c1_i32_3 : i32 to vector<1x128xi32>
    %20 = arith.cmpi sge, %16, %19 : vector<1x128xi32>
    %c15_i32 = arith.constant 15 : i32
    %21 = vector.broadcast %c15_i32 : i32 to vector<1x128xi32>
    %22 = arith.cmpi slt, %16, %21 : vector<1x128xi32>
    %c14_i32 = arith.constant 14 : i32
    %23 = vector.broadcast %c14_i32 : i32 to vector<1x128xi32>
    %24 = arith.cmpi slt, %16, %23 : vector<1x128xi32>
    %c0 = arith.constant 0 : index
    %c0_4 = arith.constant 0 : index
    %25 = vector.load %arg1[%c0, %c0_4] : memref<4x128xf32, #tpu.memory_space<vmem>>, vector<4x128xf32>
    %c1 = arith.constant 1 : index
    %c0_5 = arith.constant 0 : index
    %c0_6 = arith.constant 0 : index
    %26 = vector.load %arg2[%c1, %c0_5, %c0_6] : memref<3x8x4xf32, #tpu.memory_space<vmem>>, vector<1x8x4xf32>
    %27 = vector.shape_cast %26 : vector<1x8x4xf32> to vector<8x4xf32>
    %cst = arith.constant dense<0.000000e+00> : vector<8x128xf32>
    %28 = tpu.matmul %27, %25, %cst {dimension_numbers = #tpu.dot_dimension_numbers<[1], [0], [0], [1], [0, 0, 1, 1], [], []>} : vector<8x4xf32>, vector<4x128xf32>, vector<8x128xf32> -> vector<8x128xf32>
    %c1_i32_7 = arith.constant 1 : i32
    %29 = tpu.dynamic_rotate %25 by %c1_i32_7 dim 1 : vector<4x128xf32>, i32 -> vector<4x128xf32>
    %cst_8 = arith.constant 0.000000e+00 : f32
    %30 = vector.shape_cast %20 : vector<1x128xi1> to vector<1x128xi1>
    %31 = vector.broadcast %30 : vector<1x128xi1> to vector<4x128xi1>
    %32 = vector.broadcast %cst_8 : f32 to vector<4x128xf32>
    %33 = arith.select %31, %29, %32 : vector<4x128xi1>, vector<4x128xf32>
    %c0_9 = arith.constant 0 : index
    %c0_10 = arith.constant 0 : index
    %c0_11 = arith.constant 0 : index
    %34 = vector.load %arg2[%c0_9, %c0_10, %c0_11] : memref<3x8x4xf32, #tpu.memory_space<vmem>>, vector<1x8x4xf32>
    %35 = vector.shape_cast %34 : vector<1x8x4xf32> to vector<8x4xf32>
    %cst_12 = arith.constant dense<0.000000e+00> : vector<8x128xf32>
    %36 = tpu.matmul %35, %33, %cst_12 {dimension_numbers = #tpu.dot_dimension_numbers<[1], [0], [0], [1], [0, 0, 1, 1], [], []>} : vector<8x4xf32>, vector<4x128xf32>, vector<8x128xf32> -> vector<8x128xf32>
    %37 = arith.addf %28, %36 : vector<8x128xf32>
    %c127_i32 = arith.constant 127 : i32
    %38 = tpu.dynamic_rotate %25 by %c127_i32 dim 1 : vector<4x128xf32>, i32 -> vector<4x128xf32>
    %cst_13 = arith.constant 0.000000e+00 : f32
    %39 = vector.shape_cast %22 : vector<1x128xi1> to vector<1x128xi1>
    %40 = vector.broadcast %39 : vector<1x128xi1> to vector<4x128xi1>
    %41 = vector.broadcast %cst_13 : f32 to vector<4x128xf32>
    %42 = arith.select %40, %38, %41 : vector<4x128xi1>, vector<4x128xf32>
    %c2 = arith.constant 2 : index
    %c0_14 = arith.constant 0 : index
    %c0_15 = arith.constant 0 : index
    %43 = vector.load %arg2[%c2, %c0_14, %c0_15] : memref<3x8x4xf32, #tpu.memory_space<vmem>>, vector<1x8x4xf32>
    %44 = vector.shape_cast %43 : vector<1x8x4xf32> to vector<8x4xf32>
    %cst_16 = arith.constant dense<0.000000e+00> : vector<8x128xf32>
    %45 = tpu.matmul %44, %42, %cst_16 {dimension_numbers = #tpu.dot_dimension_numbers<[1], [0], [0], [1], [0, 0, 1, 1], [], []>} : vector<8x4xf32>, vector<4x128xf32>, vector<8x128xf32> -> vector<8x128xf32>
    %46 = arith.addf %37, %45 : vector<8x128xf32>
    %cst_17 = arith.constant 0.000000e+00 : f32
    %47 = vector.broadcast %cst_17 : f32 to vector<8x128xf32>
    %48 = arith.maximumf %46, %47 : vector<8x128xf32>
    %c2_18 = arith.constant 2 : index
    %c0_19 = arith.constant 0 : index
    %c0_20 = arith.constant 0 : index
    %49 = vector.load %arg3[%c2_18, %c0_19, %c0_20] : memref<5x4x8xf32, #tpu.memory_space<vmem>>, vector<1x4x8xf32>
    %50 = vector.shape_cast %49 : vector<1x4x8xf32> to vector<4x8xf32>
    %cst_21 = arith.constant dense<0.000000e+00> : vector<4x128xf32>
    %51 = tpu.matmul %50, %48, %cst_21 {dimension_numbers = #tpu.dot_dimension_numbers<[1], [0], [0], [1], [0, 0, 1, 1], [], []>} : vector<4x8xf32>, vector<8x128xf32>, vector<4x128xf32> -> vector<4x128xf32>
    %c2_i32_22 = arith.constant 2 : i32
    %52 = tpu.dynamic_rotate %48 by %c2_i32_22 dim 1 : vector<8x128xf32>, i32 -> vector<8x128xf32>
    %cst_23 = arith.constant 0.000000e+00 : f32
    %53 = vector.shape_cast %18 : vector<1x128xi1> to vector<1x128xi1>
    %54 = vector.broadcast %53 : vector<1x128xi1> to vector<8x128xi1>
    %55 = vector.broadcast %cst_23 : f32 to vector<8x128xf32>
    %56 = arith.select %54, %52, %55 : vector<8x128xi1>, vector<8x128xf32>
    %c0_24 = arith.constant 0 : index
    %c0_25 = arith.constant 0 : index
    %c0_26 = arith.constant 0 : index
    %57 = vector.load %arg3[%c0_24, %c0_25, %c0_26] : memref<5x4x8xf32, #tpu.memory_space<vmem>>, vector<1x4x8xf32>
    %58 = vector.shape_cast %57 : vector<1x4x8xf32> to vector<4x8xf32>
    %cst_27 = arith.constant dense<0.000000e+00> : vector<4x128xf32>
    %59 = tpu.matmul %58, %56, %cst_27 {dimension_numbers = #tpu.dot_dimension_numbers<[1], [0], [0], [1], [0, 0, 1, 1], [], []>} : vector<4x8xf32>, vector<8x128xf32>, vector<4x128xf32> -> vector<4x128xf32>
    %60 = arith.addf %51, %59 : vector<4x128xf32>
    %c1_i32_28 = arith.constant 1 : i32
    %61 = tpu.dynamic_rotate %48 by %c1_i32_28 dim 1 : vector<8x128xf32>, i32 -> vector<8x128xf32>
    %cst_29 = arith.constant 0.000000e+00 : f32
    %62 = vector.shape_cast %20 : vector<1x128xi1> to vector<1x128xi1>
    %63 = vector.broadcast %62 : vector<1x128xi1> to vector<8x128xi1>
    %64 = vector.broadcast %cst_29 : f32 to vector<8x128xf32>
    %65 = arith.select %63, %61, %64 : vector<8x128xi1>, vector<8x128xf32>
    %c1_30 = arith.constant 1 : index
    %c0_31 = arith.constant 0 : index
    %c0_32 = arith.constant 0 : index
    %66 = vector.load %arg3[%c1_30, %c0_31, %c0_32] : memref<5x4x8xf32, #tpu.memory_space<vmem>>, vector<1x4x8xf32>
    %67 = vector.shape_cast %66 : vector<1x4x8xf32> to vector<4x8xf32>
    %cst_33 = arith.constant dense<0.000000e+00> : vector<4x128xf32>
    %68 = tpu.matmul %67, %65, %cst_33 {dimension_numbers = #tpu.dot_dimension_numbers<[1], [0], [0], [1], [0, 0, 1, 1], [], []>} : vector<4x8xf32>, vector<8x128xf32>, vector<4x128xf32> -> vector<4x128xf32>
    %69 = arith.addf %60, %68 : vector<4x128xf32>
    %c127_i32_34 = arith.constant 127 : i32
    %70 = tpu.dynamic_rotate %48 by %c127_i32_34 dim 1 : vector<8x128xf32>, i32 -> vector<8x128xf32>
    %cst_35 = arith.constant 0.000000e+00 : f32
    %71 = vector.shape_cast %22 : vector<1x128xi1> to vector<1x128xi1>
    %72 = vector.broadcast %71 : vector<1x128xi1> to vector<8x128xi1>
    %73 = vector.broadcast %cst_35 : f32 to vector<8x128xf32>
    %74 = arith.select %72, %70, %73 : vector<8x128xi1>, vector<8x128xf32>
    %c3 = arith.constant 3 : index
    %c0_36 = arith.constant 0 : index
    %c0_37 = arith.constant 0 : index
    %75 = vector.load %arg3[%c3, %c0_36, %c0_37] : memref<5x4x8xf32, #tpu.memory_space<vmem>>, vector<1x4x8xf32>
    %76 = vector.shape_cast %75 : vector<1x4x8xf32> to vector<4x8xf32>
    %cst_38 = arith.constant dense<0.000000e+00> : vector<4x128xf32>
    %77 = tpu.matmul %76, %74, %cst_38 {dimension_numbers = #tpu.dot_dimension_numbers<[1], [0], [0], [1], [0, 0, 1, 1], [], []>} : vector<4x8xf32>, vector<8x128xf32>, vector<4x128xf32> -> vector<4x128xf32>
    %78 = arith.addf %69, %77 : vector<4x128xf32>
    %c126_i32 = arith.constant 126 : i32
    %79 = tpu.dynamic_rotate %48 by %c126_i32 dim 1 : vector<8x128xf32>, i32 -> vector<8x128xf32>
    %cst_39 = arith.constant 0.000000e+00 : f32
    %80 = vector.shape_cast %24 : vector<1x128xi1> to vector<1x128xi1>
    %81 = vector.broadcast %80 : vector<1x128xi1> to vector<8x128xi1>
    %82 = vector.broadcast %cst_39 : f32 to vector<8x128xf32>
    %83 = arith.select %81, %79, %82 : vector<8x128xi1>, vector<8x128xf32>
    %c4 = arith.constant 4 : index
    %c0_40 = arith.constant 0 : index
    %c0_41 = arith.constant 0 : index
    %84 = vector.load %arg3[%c4, %c0_40, %c0_41] : memref<5x4x8xf32, #tpu.memory_space<vmem>>, vector<1x4x8xf32>
    %85 = vector.shape_cast %84 : vector<1x4x8xf32> to vector<4x8xf32>
    %cst_42 = arith.constant dense<0.000000e+00> : vector<4x128xf32>
    %86 = tpu.matmul %85, %83, %cst_42 {dimension_numbers = #tpu.dot_dimension_numbers<[1], [0], [0], [1], [0, 0, 1, 1], [], []>} : vector<4x8xf32>, vector<8x128xf32>, vector<4x128xf32> -> vector<4x128xf32>
    %87 = arith.addf %78, %86 : vector<4x128xf32>
    %cst_43 = arith.constant 0.000000e+00 : f32
    %88 = vector.broadcast %cst_43 : f32 to vector<4x128xf32>
    %89 = arith.maximumf %87, %88 : vector<4x128xf32>
    %c0_44 = arith.constant 0 : index
    %c0_45 = arith.constant 0 : index
    %90 = vector.load %arg4[%c0_44, %c0_45] : memref<4x128xf32, #tpu.memory_space<vmem>>, vector<4x128xf32>
    tpu.vector_store %arg4[%c0_44, %c0_45], %89 {strides = array<i32>} : memref<4x128xf32, #tpu.memory_space<vmem>>, vector<4x128xf32>,
    return
  }
  func.func @transform_0(%arg0: i32) -> (i32, i32) {
    %c0_i32 = arith.constant 0 : i32
    %c0_i32_0 = arith.constant 0 : i32
    return %c0_i32, %arg0 : i32, i32
  }
  func.func @transform_1(%arg0: i32) -> (i32, i32, i32) {
    %c0_i32 = arith.constant 0 : i32
    %c0_i32_0 = arith.constant 0 : i32
    %c0_i32_1 = arith.constant 0 : i32
    %c0_i32_2 = arith.constant 0 : i32
    return %c0_i32, %c0_i32_0, %c0_i32_1 : i32, i32, i32
  }
  func.func @transform_2(%arg0: i32) -> (i32, i32, i32) {
    %c0_i32 = arith.constant 0 : i32
    %c0_i32_0 = arith.constant 0 : i32
    %c0_i32_1 = arith.constant 0 : i32
    %c0_i32_2 = arith.constant 0 : i32
    return %c0_i32, %c0_i32_0, %c0_i32_1 : i32, i32, i32
  }
  func.func @transform_3(%arg0: i32) -> (i32, i32) {
    %c0_i32 = arith.constant 0 : i32
    %c0_i32_0 = arith.constant 0 : i32
    return %c0_i32, %arg0 : i32, i32
  }
}

</mosaic_0001>

<bundles_post_ra>
// kernel: _lambda_.1
= control target key start
LH: loop header
LB: loop body
LE: loop exit
PB: predicated region body
PF: predicated region fallthrough
CT: control target
= control target key end

     0   :  { %s305_s14 = smov 127   ;;  %s306_s15 = smov 1   ;;  %vm45_vm0 = vcmask 1043456   ;;  %vm41_vm1 = vcmask 31744   ;;  %v14_v2 = vlaneseq  ;;  %vm138_vm4 = vcmask 64512   ;;  %s378_s0 = inlined_call_operand.vmem [shape: f32[4,128], index: 0, kind: input, shape index: {}]   ;;  %s379_s1 = inlined_call_operand.vmem [shape: f32[3,8,4], index: 1, kind: input, shape index: {}]   ;;  %s380_s2 = inlined_call_operand.vmem [shape: f32[5,4,8], index: 2, kind: input, shape index: {}]   ;;  %s381_s3 = inlined_call_operand.vmem [shape: f32[4,128], index: 3, kind: output, shape index: {}]  }
   0x1   :  { %v32_v0 = vld [vmem:[%s378_s0] sm:$0xf]  ;;  %v280_v1 = vld [vmem:[%s379_s1 + $0x8] sm:$0xff]  ;;  %v285_v6 = vld [vmem:[%s379_s1 + $0x10] sm:$0xff]  ;;  %s307_s21 = smov 126   ;;  %s308_s22 = smov 2  }
   0x2   :  { %95 = vrot.lane.b32.xlu0 %v32_v0, %s305_s14  ;;  %283 = vmatpush.msk.msra.mxu1 %vm45_vm0, %v32_v0  ;;  %v15_v3 = vand.u32 127, %v14_v2  ;;  %v40_v9 = vld [vmem:[%s379_s1] sm:$0xff]  ;;  %v288_v18 = vld [vmem:[%s380_s2 + $0x8] sm:$0xf]  ;;  %v295_v23 = vld [vmem:[%s380_s2 + $0xc] sm:$0xf] }
   0x3   :  { %284 = vmatmul.msk.f32.vlgmr.msra.gmra.mxu1 %vm41_vm1, %v280_v1  ;;  %v292_v19 = vld [vmem:[%s380_s2 + $0x4] sm:$0xf]  ;;  %v137_v22 = vld [vmem:[%s380_s2] sm:$0xf]  ;;  %v298_v25 = vld [vmem:[%s380_s2 + $0x10] sm:$0xf] }
   0x4   :  { %v20_v4 = vand.u32 15, %v15_v3 }
   0x6   :  { %vm30_vm2 = vcmp.lt.s32.totalorder %v20_v4, 15  ;;  %vm29_vm3 = vcmp.ge.s32.totalorder %v20_v4, 1  ;;  %vm28_vm5 = vcmp.ge.s32.totalorder %v20_v4, 2  ;;  %vm31_vm6 = vcmp.lt.s32.totalorder %v20_v4, 14 }
   0xa   :  { %35 = vrot.lane.b32.xlu0 %v32_v0, %s306_s15 }
  0x74   :  { %v96_v5 = vpop.permute.xlu0 %95 }
  0x75   :  { %v99_v7 = vsel %vm30_vm2, %v96_v5, 0.0 }
  0x76   :  { %286 = vmatpush.msk.msra.mxu2 %vm45_vm0, %v99_v7 }
  0x77   :  { %287 = vmatmul.msk.f32.vlgmr.msra.gmra.mxu2 %vm41_vm1, %v285_v6 }
  0x7c   :  { %v36_v8 = vpop.permute.xlu0 %35 }
  0x7d   :  { %v39_v10 = vsel %vm29_vm3, %v36_v8, 0.0 }
  0x7e   :  { %281 = vmatpush.msk.msra.mxu0 %vm45_vm0, %v39_v10 }
  0x7f   :  { %282 = vmatmul.msk.f32.vlgmr.msra.gmra.mxu0 %vm41_vm1, %v40_v9 }
  0x80   :  { %v92_v11 = vpop.f32.mrf.mxu1 }
  0xfa   :  { %v125_v13 = vpop.f32.mrf.mxu2 }
  0xfc   :  { %v66_v12 = vpop.f32.mrf.mxu0 }
  0xfd   :  { %v93_v14 = vadd.f32 %v92_v11, %v66_v12 }
  0xff   :  { %v128_v15 = vadd.f32 %v125_v13, %v93_v14 }
 0x101   :  { %v129_v16 = vmax.f32 %v128_v15, 0.0 }
 0x103   :  { %243 = vrot.lane.b32.xlu2 %v129_v16, %s307_s21  ;;  %132 = vrot.lane.b32.xlu1 %v129_v16, %s308_s22 }
 0x104   :  { %180 = vmatpush.msrb.mxu0 %v129_v16 }
 0x105   :  { %291 = vmatmul.msk.f32.vlgmr.msrb.gmra.mxu0 %vm138_vm4, %v288_v18 }
 0x10b   :  { %185 = vrot.lane.b32.xlu2 %v129_v16, %s306_s15  ;;  %214 = vrot.lane.b32.xlu1 %v129_v16, %s305_s14 }
 0x15d   :  { %v244_v17 = vpop.permute.xlu2 %243 }
 0x165   :  { %v186_v20 = vpop.permute.xlu2 %185 }
 0x166   :  { %293 = vmatpush.msk.msrb.mxu1 %vm29_vm3, %v186_v20 }
 0x167   :  { %294 = vmatmul.msk.f32.vlgmr.msrb.gmra.mxu1 %vm138_vm4, %v292_v19 }
 0x175   :  { %v133_v21 = vpop.permute.xlu1 %132 }
 0x176   :  { %289 = vmatpush.msk.msra.mxu3 %vm28_vm5, %v133_v21 }
 0x177   :  { %290 = vmatmul.msk.f32.vlgmr.msra.gmra.mxu3 %vm138_vm4, %v137_v22 }
 0x178   :  { %299 = vmatpush.msk.msrb.mxu3 %vm31_vm6, %v244_v17 }
 0x17d   :  { %v215_v24 = vpop.permute.xlu1 %214 }
 0x17e   :  { %296 = vmatpush.msk.msrb.mxu2 %vm30_vm2, %v215_v24 }
 0x17f   :  { %297 = vmatmul.msk.f32.vlgmr.msrb.gmra.mxu2 %vm138_vm4, %v295_v23  ;;  %300 = vmatmul.msk.f32.vlgmr.msrb.gmra.mxu3 %vm138_vm4, %v298_v25 }
 0x182   :  { %v182_v26 = vpop.f32.mrf.mxu0 }
 0x1e4   :  { %v210_v29 = vpop.f32.mrf.mxu1 }
 0x1fa   :  { %v159_v27 = vpop.f32.mrf.mxu3 }
 0x1fb   :  { %v183_v28 = vadd.f32 %v182_v26, %v159_v27 }
 0x1fd   :  { %v213_v30 = vadd.f32 %v210_v29, %v183_v28 }
 0x202   :  { %v239_v31 = vpop.f32.mrf.mxu2  ;;  %v270_v33 = vpop.f32.mrf.mxu3 }
 0x203   :  { %v242_v32 = vadd.f32 %v239_v31, %v213_v30 }
 0x205   :  { %v273_v34 = vadd.f32 %v270_v33, %v242_v32 }
 0x207   :  { %v274_v35 = vmax.f32 %v273_v34, 0.0 }
 0x209   :  { %275 = vst [vmem:[%s381_s3] sm:$0xf] %v274_v35 }

</bundles_post_ra>
